<compile_context>
chip_gen: v7x
topology: tpu7x:2x2x1
jax: 0.10.0
libtpu: 0.0.40
codegen_flags: <defaults>
</compile_context>

<pallas_src>
import functools

import jax
import jax.numpy as jnp
from jax import lax
from jax.experimental import pallas as pl
from jax.experimental.pallas import tpu as pltpu

LOG_STD_MAX = 2.0
LOG_STD_MIN = -5.0
# log_std = A*tanh(z) + B   (mathematically identical to the original affine)
LOG_STD_SCALE = 0.5 * (LOG_STD_MAX - LOG_STD_MIN)
LOG_STD_SHIFT = LOG_STD_MIN + LOG_STD_SCALE


def _round_up(n, m):
    return ((n + m - 1) // m) * m


def actor_kernel(x_ref, w1_ref, b1_ref, w2_ref, b2_ref, wh_ref, bh_ref,
                 out_ref, *, num_actions):
    # fc1 + relu  (bf16 MXU operands, f32 accumulation)
    h1 = jnp.dot(x_ref[...], w1_ref[...], preferred_element_type=jnp.float32)
    h1 = jnp.maximum(h1 + b1_ref[...], 0.0)

    # fc2 + relu
    h2 = jnp.dot(h1.astype(jnp.bfloat16), w2_ref[...],
                 preferred_element_type=jnp.float32)
    h2 = jnp.maximum(h2 + b2_ref[...], 0.0)

    # fused heads: columns [0, A) = mean, [A, 2A) = log_std (pre-squash),
    # columns >= 2A are zero-padding (sliced away in the wrapper).
    z = jnp.dot(h2.astype(jnp.bfloat16), wh_ref[...],
                preferred_element_type=jnp.float32)
    z = z + bh_ref[...]

    squashed = LOG_STD_SCALE * jnp.tanh(z) + LOG_STD_SHIFT      # tanh -> EUP slot
    col = lax.broadcasted_iota(jnp.int32, z.shape, 1)
    out_ref[...] = jnp.where(col < num_actions, z, squashed).astype(out_ref.dtype)


def pack_params(params):
    """One-time packing: bf16 cast, obs-dim zero pad, head fusion + lane pad."""
    obs_dim, hidden = params["w1"].shape
    num_actions = params["wm"].shape[1]
    obs_pad = _round_up(max(obs_dim, 128), 128)
    head_pad = _round_up(max(2 * num_actions, 128), 128)

    w1 = jnp.zeros((obs_pad, hidden), jnp.bfloat16)
    w1 = w1.at[:obs_dim, :].set(params["w1"].astype(jnp.bfloat16))

    wh = jnp.concatenate([params["wm"], params["ws"]], axis=1)        # (hidden, 2A)
    wh = jnp.pad(wh, ((0, 0), (0, head_pad - 2 * num_actions)))
    bh = jnp.concatenate([params["bm"], params["bs"]], axis=1)        # (1, 2A)
    bh = jnp.pad(bh, ((0, 0), (0, head_pad - 2 * num_actions)))

    packed = {
        "w1": w1,
        "b1": params["b1"].astype(jnp.float32),
        "w2": params["w2"].astype(jnp.bfloat16),
        "b2": params["b2"].astype(jnp.float32),
        "wh": wh.astype(jnp.bfloat16),
        "bh": bh.astype(jnp.float32),
    }
    meta = {"obs_dim": obs_dim, "obs_pad": obs_pad,
            "num_actions": num_actions, "head_pad": head_pad}
    return packed, meta


def actor_forward(x, packed, meta):
    """x: (B, obs_dim) f32 -> (mean, log_std), each (B, num_actions) f32."""
    B = x.shape[0]
    A = meta["num_actions"]
    obs_dim, obs_pad, head_pad = meta["obs_dim"], meta["obs_pad"], meta["head_pad"]

    # Sublane-align the batch (free zero rows, sliced away below).
    B_pad = _round_up(max(B, 8), 8)

    xb = x.astype(jnp.bfloat16)
    pad_rows = B_pad - B
    pad_cols = obs_pad - obs_dim
    if pad_rows or pad_cols:
        xb = jnp.pad(xb, ((0, pad_rows), (0, pad_cols)))

    vmem = pl.BlockSpec(memory_space=pltpu.MemorySpace.VMEM)

    out = pl.pallas_call(
        functools.partial(actor_kernel, num_actions=A),
        out_shape=jax.ShapeDtypeStruct((B_pad, head_pad), jnp.float32),
        in_specs=[vmem] * 7,
        out_specs=vmem,
        compiler_params=pltpu.CompilerParams(vmem_limit_bytes=16 << 20),
    )(xb, packed["w1"], packed["b1"], packed["w2"], packed["b2"],
      packed["wh"], packed["bh"])

    mean = out[:B, :A]
    log_std = out[:B, A:2 * A]
    return mean, log_std


def init_params(key, obs_dim, hidden, num_actions):
    """Deterministic synthetic init (uniform, like torch Linear default scale)."""
    ks = jax.random.split(key, 8)

    def lin(kw, kb, fan_in, fan_out):
        bound = 1.0 / jnp.sqrt(jnp.float32(fan_in))
        w = jax.random.uniform(kw, (fan_in, fan_out), jnp.float32, -bound, bound)
        b = jax.random.uniform(kb, (1, fan_out), jnp.float32, -bound, bound)
        return w, b

    w1, b1 = lin(ks[0], ks[1], obs_dim, hidden)
    w2, b2 = lin(ks[2], ks[3], hidden, hidden)
    wm, bm = lin(ks[4], ks[5], hidden, num_actions)
    ws, bs = lin(ks[6], ks[7], hidden, num_actions)
    return {"w1": w1, "b1": b1, "w2": w2, "b2": b2,
            "wm": wm, "bm": bm, "ws": ws, "bs": bs}


def actor_forward_ref_f32(x, p):
    """Pure f32 reference (original module semantics)."""
    h1 = jnp.maximum(x @ p["w1"] + p["b1"], 0.0)
    h2 = jnp.maximum(h1 @ p["w2"] + p["b2"], 0.0)
    mean = h2 @ p["wm"] + p["bm"]
    log_std = jnp.tanh(h2 @ p["ws"] + p["bs"])
    log_std = LOG_STD_MIN + 0.5 * (LOG_STD_MAX - LOG_STD_MIN) * (log_std + 1.0)
    return mean, log_std


def actor_forward_ref_bf16(x, p):
    """Precision-matched reference: bf16 MXU operands, f32 accumulation."""
    bf = jnp.bfloat16
    h1 = jnp.dot(x.astype(bf), p["w1"].astype(bf),
                 preferred_element_type=jnp.float32) + p["b1"]
    h1 = jnp.maximum(h1, 0.0)
    h2 = jnp.dot(h1.astype(bf), p["w2"].astype(bf),
                 preferred_element_type=jnp.float32) + p["b2"]
    h2 = jnp.maximum(h2, 0.0)
    mean = jnp.dot(h2.astype(bf), p["wm"].astype(bf),
                   preferred_element_type=jnp.float32) + p["bm"]
    z = jnp.dot(h2.astype(bf), p["ws"].astype(bf),
                preferred_element_type=jnp.float32) + p["bs"]
    log_std = LOG_STD_SCALE * jnp.tanh(z) + LOG_STD_SHIFT
    return mean, log_std


if __name__ == "__main__":
    key = jax.random.PRNGKey(0)
    k_x, k_p = jax.random.split(key)

    batch = 8
    obs_dim = 64      # env.num_obs (flattened)
    hidden = 256
    num_actions = 8   # env.num_actions

    x = jax.random.normal(k_x, (batch, obs_dim), jnp.float32)
    params = init_params(k_p, obs_dim, hidden, num_actions)
    packed, meta = pack_params(params)

    mean, log_std = actor_forward(x, packed, meta)
    jax.block_until_ready((mean, log_std))

    # Precision-matched reference (bf16 operands, f32 accumulation): tight check.
    mean_b, log_std_b = actor_forward_ref_bf16(x, params)
    assert jnp.allclose(mean, mean_b, atol=5e-3, rtol=5e-3)
    assert jnp.allclose(log_std, log_std_b, atol=5e-3, rtol=5e-3)

    # Full-f32 reference (module semantics): loose check accounting for bf16 weights.
    mean_f, log_std_f = actor_forward_ref_f32(x, params)
    assert jnp.allclose(mean, mean_f, atol=5e-2, rtol=5e-2)
    assert jnp.allclose(log_std, log_std_f, atol=5e-2, rtol=5e-2)

    assert mean.shape == (batch, num_actions)
    assert log_std.shape == (batch, num_actions)
    assert bool(jnp.all(log_std >= LOG_STD_MIN)) and bool(jnp.all(log_std <= LOG_STD_MAX))

    print("KERNEL_OK")
</pallas_src>

<mosaic_0001>
module attributes {stable_mosaic.version = 11 : i64} {
  func.func @actor_kernel(%arg0: memref<8x128xbf16, #tpu.memory_space<vmem>>, %arg1: memref<128x256xbf16, #tpu.memory_space<vmem>>, %arg2: memref<1x256xf32, #tpu.memory_space<vmem>>, %arg3: memref<256x256xbf16, #tpu.memory_space<vmem>>, %arg4: memref<1x256xf32, #tpu.memory_space<vmem>>, %arg5: memref<256x128xbf16, #tpu.memory_space<vmem>>, %arg6: memref<1x128xf32, #tpu.memory_space<vmem>>, %arg7: memref<8x128xf32, #tpu.memory_space<vmem>>) attributes {dimension_semantics = [], scalar_prefetch = 0 : i64, scratch_operands = 0 : i64, tpu.core_type = #tpu.core_type<tc>} {
    %c0 = arith.constant 0 : index
    %c0_0 = arith.constant 0 : index
    %0 = vector.load %arg0[%c0, %c0_0] : memref<8x128xbf16, #tpu.memory_space<vmem>>, vector<8x128xbf16>
    %c0_1 = arith.constant 0 : index
    %c0_2 = arith.constant 0 : index
    %1 = vector.load %arg1[%c0_1, %c0_2] : memref<128x256xbf16, #tpu.memory_space<vmem>>, vector<128x256xbf16>
    %cst = arith.constant dense<0.000000e+00> : vector<8x256xf32>
    %2 = tpu.matmul %0, %1, %cst {dimension_numbers = #tpu.dot_dimension_numbers<[1], [0], [0], [1], [0, 0, 1, 1], [], []>} : vector<8x128xbf16>, vector<128x256xbf16>, vector<8x256xf32> -> vector<8x256xf32>
    %c0_3 = arith.constant 0 : index
    %c0_4 = arith.constant 0 : index
    %3 = vector.load %arg2[%c0_3, %c0_4] : memref<1x256xf32, #tpu.memory_space<vmem>>, vector<1x256xf32>
    %4 = vector.broadcast %3 : vector<1x256xf32> to vector<8x256xf32>
    %5 = arith.addf %2, %4 : vector<8x256xf32>
    %cst_5 = arith.constant 0.000000e+00 : f32
    %6 = vector.broadcast %cst_5 : f32 to vector<8x256xf32>
    %7 = arith.maximumf %5, %6 : vector<8x256xf32>
    %8 = arith.truncf %7 : vector<8x256xf32> to vector<8x256xbf16>
    %c0_6 = arith.constant 0 : index
    %c0_7 = arith.constant 0 : index
    %9 = vector.load %arg3[%c0_6, %c0_7] : memref<256x256xbf16, #tpu.memory_space<vmem>>, vector<256x256xbf16>
    %cst_8 = arith.constant dense<0.000000e+00> : vector<8x256xf32>
    %10 = tpu.matmul %8, %9, %cst_8 {dimension_numbers = #tpu.dot_dimension_numbers<[1], [0], [0], [1], [0, 0, 1, 1], [], []>} : vector<8x256xbf16>, vector<256x256xbf16>, vector<8x256xf32> -> vector<8x256xf32>
    %c0_9 = arith.constant 0 : index
    %c0_10 = arith.constant 0 : index
    %11 = vector.load %arg4[%c0_9, %c0_10] : memref<1x256xf32, #tpu.memory_space<vmem>>, vector<1x256xf32>
    %12 = vector.broadcast %11 : vector<1x256xf32> to vector<8x256xf32>
    %13 = arith.addf %10, %12 : vector<8x256xf32>
    %cst_11 = arith.constant 0.000000e+00 : f32
    %14 = vector.broadcast %cst_11 : f32 to vector<8x256xf32>
    %15 = arith.maximumf %13, %14 : vector<8x256xf32>
    %16 = arith.truncf %15 : vector<8x256xf32> to vector<8x256xbf16>
    %c0_12 = arith.constant 0 : index
    %c0_13 = arith.constant 0 : index
    %17 = vector.load %arg5[%c0_12, %c0_13] : memref<256x128xbf16, #tpu.memory_space<vmem>>, vector<256x128xbf16>
    %cst_14 = arith.constant dense<0.000000e+00> : vector<8x128xf32>
    %18 = tpu.matmul %16, %17, %cst_14 {dimension_numbers = #tpu.dot_dimension_numbers<[1], [0], [0], [1], [0, 0, 1, 1], [], []>} : vector<8x256xbf16>, vector<256x128xbf16>, vector<8x128xf32> -> vector<8x128xf32>
    %c0_15 = arith.constant 0 : index
    %c0_16 = arith.constant 0 : index
    %19 = vector.load %arg6[%c0_15, %c0_16] : memref<1x128xf32, #tpu.memory_space<vmem>>, vector<1x128xf32>
    %20 = vector.broadcast %19 : vector<1x128xf32> to vector<8x128xf32>
    %21 = arith.addf %18, %20 : vector<8x128xf32>
    %22 = math.tanh %21 : vector<8x128xf32>
    %cst_17 = arith.constant 3.500000e+00 : f32
    %23 = vector.broadcast %cst_17 : f32 to vector<8x128xf32>
    %24 = arith.mulf %23, %22 : vector<8x128xf32>
    %cst_18 = arith.constant -1.500000e+00 : f32
    %25 = vector.broadcast %cst_18 : f32 to vector<8x128xf32>
    %26 = arith.addf %24, %25 : vector<8x128xf32>
    %27 = tpu.iota {dimensions = array<i32: 1>} : vector<8x128xi32>
    %c8_i32 = arith.constant 8 : i32
    %28 = vector.broadcast %c8_i32 : i32 to vector<8x128xi32>
    %29 = arith.cmpi slt, %27, %28 : vector<8x128xi32>
    %30 = arith.select %29, %21, %26 : vector<8x128xi1>, vector<8x128xf32>
    %c0_19 = arith.constant 0 : index
    %c0_20 = arith.constant 0 : index
    %31 = vector.load %arg7[%c0_19, %c0_20] : memref<8x128xf32, #tpu.memory_space<vmem>>, vector<8x128xf32>
    tpu.vector_store %arg7[%c0_19, %c0_20], %30 {strides = array<i32>} : memref<8x128xf32, #tpu.memory_space<vmem>>, vector<8x128xf32>,
    return
  }
}

</mosaic_0001>

<bundles_post_ra>
// kernel: tpu_custom_call.1
= control target key start
LH: loop header
LB: loop body
LE: loop exit
PB: predicated region body
PF: predicated region fallthrough
CT: control target
= control target key end

     0   :  { %12 = vsyncpa [#allocation3], 0  ;;  %s1114_s0 = inlined_call_operand.hbm [shape: bf16[8,128], index: 0, kind: input, shape index: {}]   ;;  %s1115_s1 = inlined_call_operand.hbm [shape: bf16[128,256], index: 1, kind: input, shape index: {}]   ;;  %s1116_s2 = inlined_call_operand.vmem [shape: f32[1,256], index: 2, kind: input, shape index: {}]   ;;  %s1117_s3 = inlined_call_operand.hbm [shape: bf16[256,256], index: 3, kind: input, shape index: {}]   ;;  %s1118_s4 = inlined_call_operand.vmem [shape: f32[1,256], index: 4, kind: input, shape index: {}]   ;;  %s1119_s5 = inlined_call_operand.hbm [shape: bf16[256,128], index: 5, kind: input, shape index: {}]   ;;  %s1120_s6 = inlined_call_operand.vmem [shape: f32[1,128], index: 6, kind: input, shape index: {}]   ;;  %s1121_s7 = inlined_call_operand.hbm [shape: f32[8,128], index: 7, kind: output, shape index: {}]  }
   0x1   :  { %13 = vsyncpa [#allocation6], 0 }
   0x2   :  { %14 = vsyncpa [#allocation9], 0 }
   0x3   :  { %15 = vsyncpa [#allocation4], 0  ;;  %s989_s24 = smov [#allocation5]   ;;  %s871_s28 = scalar_lea.hbm %s1115_s1, 2048 }
   0x4   :  { %s31_s25 = sshll.u32 %s989_s24, 4  ;;  %p872_p0 = scmp.ne.s32.totalorder %s1115_s1, %s871_s28  ;;  %s32_s25 = int_to_ptr.vmem [resolvable:$true] %s31_s25 }
   0x5   :  { %p875_p1 = scmp.lt.u32.totalorder %s871_s28, %s1115_s1 }
   0x7   :  { %p877_p2 = pnand %p875_p1, %p872_p0 }
   0x9   :  { %880 = shalt.err (!%p877_p2)
}
   0xa   :  { %s881_s10 = scalar_lea.vmem %s32_s25, 2048  ;;  %p886_p4 = scmp.lt.s32.totalorder %s32_s25, %s32_s25 }
   0xb   :  { %p882_p3 = scmp.ne.s32.totalorder %s32_s25, %s881_s10  ;;  %p887_p5 = scmp.lt.s32.totalorder %s881_s10, %s881_s10 }
   0xd   :  { %p888_p6 = por %p887_p5, %p886_p4 }
   0xf   :  { %p889_p7 = pnand %p888_p6, %p882_p3 }
  0x11   :  { %892 = shalt.err (!%p889_p7)
}
  0x12   :  { %s990_s11 = smov 128   ;;  %s991_s12 = smov 8  }
  0x13   :  { %37 = dma.hbm_to_vmem [thread:$0]  %s1115_s1, 2048, %s32_s25, [#allocation6], %s990_s11, %s990_s11, %s991_s12  }
  0x14   :  { %s992_s15 = smov [#allocation2]   ;;  %s993_s17 = smov [#allocation7]  }
  0x15   :  { %s22_s16 = sshll.u32 %s992_s15, 4  ;;  %s45_s18 = sshll.u32 %s993_s17, 4  ;;  %s23_s16 = int_to_ptr.vmem [resolvable:$true] %s22_s16  ;;  %s46_s18 = int_to_ptr.vmem [resolvable:$true] %s45_s18 }
  0x16   :  { %s893_s21 = scalar_lea.hbm %s1114_s0, 64 }
  0x17   :  { %p894_p8 = scmp.ne.s32.totalorder %s1114_s0, %s893_s21  ;;  %p897_p9 = scmp.lt.u32.totalorder %s893_s21, %s1114_s0 }
  0x19   :  { %p899_p10 = pnand %p897_p9, %p894_p8 }
  0x1b   :  { %902 = shalt.err (!%p899_p10)
}
  0x1c   :  { %s903_s1 = scalar_lea.vmem %s23_s16, 64  ;;  %p908_p12 = scmp.lt.s32.totalorder %s23_s16, %s23_s16 }
  0x1d   :  { %p904_p11 = scmp.ne.s32.totalorder %s23_s16, %s903_s1  ;;  %p909_p13 = scmp.lt.s32.totalorder %s903_s1, %s903_s1 }
  0x1f   :  { %p910_p0 = por %p909_p13, %p908_p12 }
  0x21   :  { %p911_p1 = pnand %p910_p0, %p904_p11 }
  0x23   :  { %914 = shalt.err (!%p911_p1)
}
  0x24   :  { %25 = dma.hbm_to_vmem [thread:$0]  %s1114_s0, 64, %s23_s16, [#allocation3]  }
  0x25   :  { %s915_s30 = scalar_lea.hbm %s1117_s3, 4096 }
  0x26   :  { %p916_p2 = scmp.ne.s32.totalorder %s1117_s3, %s915_s30  ;;  %p919_p3 = scmp.lt.u32.totalorder %s915_s30, %s1117_s3 }
  0x28   :  { %p921_p4 = pnand %p919_p3, %p916_p2 }
  0x2a   :  { %924 = shalt.err (!%p921_p4)
}
  0x2b   :  { %s925_s14 = scalar_lea.vmem %s46_s18, 4096  ;;  %p930_p6 = scmp.lt.s32.totalorder %s46_s18, %s46_s18 }
  0x2c   :  { %p926_p5 = scmp.ne.s32.totalorder %s46_s18, %s925_s14  ;;  %p931_p7 = scmp.lt.s32.totalorder %s925_s14, %s925_s14 }
  0x2e   :  { %p932_p8 = por %p931_p7, %p930_p6 }
  0x30   :  { %p933_p9 = pnand %p932_p8, %p926_p5 }
  0x32   :  { %936 = shalt.err (!%p933_p9)
}
  0x33   :  { %51 = dma.hbm_to_vmem [thread:$0]  %s1117_s3, 4096, %s46_s18, [#allocation6], %s990_s11, %s990_s11, %s991_s12  }
  0x34   :  { %s994_s16 = smov [#allocation8]   ;;  %s937_s21 = scalar_lea.hbm %s1119_s5, 2048 }
  0x35   :  { %s59_s17 = sshll.u32 %s994_s16, 4  ;;  %p938_p10 = scmp.ne.s32.totalorder %s1119_s5, %s937_s21  ;;  %s60_s17 = int_to_ptr.vmem [resolvable:$true] %s59_s17 }
  0x36   :  { %p941_p11 = scmp.lt.u32.totalorder %s937_s21, %s1119_s5 }
  0x38   :  { %p943_p12 = pnand %p941_p11, %p938_p10 }
  0x3a   :  { %946 = shalt.err (!%p943_p12)
}
  0x3b   :  { %s947_s1 = scalar_lea.vmem %s60_s17, 2048  ;;  %p952_p0 = scmp.lt.s32.totalorder %s60_s17, %s60_s17 }
  0x3c   :  { %p948_p13 = scmp.ne.s32.totalorder %s60_s17, %s947_s1  ;;  %p953_p1 = scmp.lt.s32.totalorder %s947_s1, %s947_s1 }
  0x3e   :  { %p954_p2 = por %p953_p1, %p952_p0 }
  0x40   :  { %p955_p3 = pnand %p954_p2, %p948_p13 }
  0x42   :  { %958 = shalt.err (!%p955_p3)
}
  0x43   :  { %s995_s3 = smov 64   ;;  %s996_s11 = smov 4  }
  0x44   :  { %65 = dma.hbm_to_vmem [thread:$0]  %s1119_s5, 2048, %s60_s17, [#allocation9], %s995_s3, %s995_s3, %s996_s11  }
  0x45   :  { %981 = dma.done.wait [#allocation3], 64  }
  0x46   :  { %982 = vsyncadd [#allocation3], 4294967232 }
  0x47   :  { %983 = dma.done.wait [#allocation6], 6144  }
  0x48   :  { %984 = vsyncadd [#allocation6], 4294961152 }
  0x49   :  { %985 = dma.done.wait [#allocation9], 2048  }
  0x4a   :  { %986 = vsyncadd [#allocation9], 4294965248  ;;  %v997_v0 = vmov 0   ;;  %v781_v1 = vld [vmem:[#allocation5 + $0x4] ss:$8 sps:$4 sm:$0xff]   ;;  %v857_v54 = vld [vmem:[#allocation8 + $0x50] sm:$0xff]   ;;  %v100_v62 = vlaneseq }
  0x4b   :  { %222 = vmatprep.mubr.bf16.mxu0 %v997_v0  ;;  %v783_v2 = vld [vmem:[#allocation5] ss:$8 sps:$4 sm:$0xff]   ;;  %190 = vmatprep.subr.bf16.mxu0 %v781_v1  ;;  %v784_v3 = vld [vmem:[#allocation5 + $0x14] ss:$8 sps:$4 sm:$0xff]   ;;  %v786_v4 = vld [vmem:[#allocation5 + $0x10] ss:$8 sps:$4 sm:$0xff]  }
  0x4c   :  { %191 = vmatpush1.bf16.msra.mxu0 %v783_v2  ;;  %v787_v5 = vld [vmem:[#allocation5 + $0x24] ss:$8 sps:$4 sm:$0xff]   ;;  %v789_v6 = vld [vmem:[#allocation5 + $0x20] ss:$8 sps:$4 sm:$0xff]   ;;  %v790_v7 = vld [vmem:[#allocation5 + $0x34] ss:$8 sps:$4 sm:$0xff]  }
  0x4d   :  { %192 = vmatprep.subr.bf16.mxu0 %v784_v3  ;;  %v792_v8 = vld [vmem:[#allocation5 + $0x30] ss:$8 sps:$4 sm:$0xff]   ;;  %v793_v9 = vld [vmem:[#allocation5 + $0x44] ss:$8 sps:$4 sm:$0xff]   ;;  %v807_v11 = vld [vmem:[#allocation7] ss:$8 sps:$4 sm:$0xff]  }
  0x4e   :  { %v805_v10 = vld [vmem:[#allocation7 + $0x4] ss:$8 sps:$4 sm:$0xff]   ;;  %v808_v12 = vld [vmem:[#allocation7 + $0x14] ss:$8 sps:$4 sm:$0xff]   ;;  %v795_v13 = vld [vmem:[#allocation5 + $0x40] ss:$8 sps:$4 sm:$0xff]  }
  0x4f   :  { %439 = vmatprep.subr.bf16.mxu1 %v805_v10  ;;  %v810_v14 = vld [vmem:[#allocation7 + $0x10] ss:$8 sps:$4 sm:$0xff]   ;;  %v811_v15 = vld [vmem:[#allocation7 + $0x24] ss:$8 sps:$4 sm:$0xff]   ;;  %v796_v16 = vld [vmem:[#allocation5 + $0x54] ss:$8 sps:$4 sm:$0xff]  }
  0x50   :  { %193 = vmatpush1.bf16.msra.mxu0 %v786_v4  ;;  %440 = vmatpush1.bf16.msra.mxu1 %v807_v11  ;;  %v798_v17 = vld [vmem:[#allocation5 + $0x50] ss:$8 sps:$4 sm:$0xff]   ;;  %v813_v18 = vld [vmem:[#allocation7 + $0x20] ss:$8 sps:$4 sm:$0xff]   ;;  %v814_v19 = vld [vmem:[#allocation7 + $0x34] ss:$8 sps:$4 sm:$0xff]  }
  0x51   :  { %194 = vmatprep.subr.bf16.mxu0 %v787_v5  ;;  %441 = vmatprep.subr.bf16.mxu1 %v808_v12  ;;  %v799_v20 = vld [vmem:[#allocation5 + $0x64] ss:$8 sps:$4 sm:$0xff]   ;;  %v801_v21 = vld [vmem:[#allocation5 + $0x60] ss:$8 sps:$4 sm:$0xff]   ;;  %v816_v22 = vld [vmem:[#allocation7 + $0x30] ss:$8 sps:$4 sm:$0xff]  }
  0x52   :  { %v817_v23 = vld [vmem:[#allocation7 + $0x44] ss:$8 sps:$4 sm:$0xff]   ;;  %v802_v24 = vld [vmem:[#allocation5 + $0x74] ss:$8 sps:$4 sm:$0xff]   ;;  %v804_v25 = vld [vmem:[#allocation5 + $0x70] ss:$8 sps:$4 sm:$0xff]  }
  0x53   :  { %v819_v26 = vld [vmem:[#allocation7 + $0x40] ss:$8 sps:$4 sm:$0xff]   ;;  %v820_v27 = vld [vmem:[#allocation7 + $0x54] ss:$8 sps:$4 sm:$0xff]   ;;  %v822_v29 = vld [vmem:[#allocation7 + $0x50] ss:$8 sps:$4 sm:$0xff]  }
  0x54   :  { %195 = vmatpush1.bf16.msra.mxu0 %v789_v6  ;;  %442 = vmatpush1.bf16.msra.mxu1 %v810_v14  ;;  %v81_v28 = vld [vmem:[#allocation2] sm:$0xf]  ;;  %v823_v30 = vld [vmem:[#allocation7 + $0x64] ss:$8 sps:$4 sm:$0xff]   ;;  %v825_v31 = vld [vmem:[#allocation7 + $0x60] ss:$8 sps:$4 sm:$0xff]  }
  0x55   :  { %196 = vmatprep.subr.bf16.mxu0 %v790_v7  ;;  %443 = vmatprep.subr.bf16.mxu1 %v811_v15  ;;  %v826_v32 = vld [vmem:[#allocation7 + $0x74] ss:$8 sps:$4 sm:$0xff]   ;;  %v828_v33 = vld [vmem:[#allocation7 + $0x70] ss:$8 sps:$4 sm:$0xff]   ;;  %v829_v34 = vld [vmem:[#allocation7 + $0x84] ss:$8 sps:$4 sm:$0xff]  }
  0x56   :  { %v831_v35 = vld [vmem:[#allocation7 + $0x80] ss:$8 sps:$4 sm:$0xff]   ;;  %v832_v36 = vld [vmem:[#allocation7 + $0x94] ss:$8 sps:$4 sm:$0xff]   ;;  %v834_v37 = vld [vmem:[#allocation7 + $0x90] ss:$8 sps:$4 sm:$0xff]  }
  0x57   :  { %v835_v38 = vld [vmem:[#allocation7 + $0xa4] ss:$8 sps:$4 sm:$0xff]   ;;  %v837_v39 = vld [vmem:[#allocation7 + $0xa0] ss:$8 sps:$4 sm:$0xff]   ;;  %v838_v40 = vld [vmem:[#allocation7 + $0xb4] ss:$8 sps:$4 sm:$0xff]  }
  0x58   :  { %197 = vmatpush1.bf16.msra.mxu0 %v792_v8  ;;  %444 = vmatpush1.bf16.msra.mxu1 %v813_v18  ;;  %v840_v41 = vld [vmem:[#allocation7 + $0xb0] ss:$8 sps:$4 sm:$0xff]   ;;  %v841_v42 = vld [vmem:[#allocation7 + $0xc4] ss:$8 sps:$4 sm:$0xff]   ;;  %v843_v43 = vld [vmem:[#allocation7 + $0xc0] ss:$8 sps:$4 sm:$0xff]  }
  0x59   :  { %198 = vmatprep.subr.bf16.mxu0 %v793_v9  ;;  %445 = vmatprep.subr.bf16.mxu1 %v814_v19  ;;  %v844_v44 = vld [vmem:[#allocation7 + $0xd4] ss:$8 sps:$4 sm:$0xff]   ;;  %v846_v45 = vld [vmem:[#allocation7 + $0xd0] ss:$8 sps:$4 sm:$0xff]   ;;  %v847_v46 = vld [vmem:[#allocation7 + $0xe4] ss:$8 sps:$4 sm:$0xff]  }
  0x5a   :  { %v849_v47 = vld [vmem:[#allocation7 + $0xe0] ss:$8 sps:$4 sm:$0xff]   ;;  %v850_v48 = vld [vmem:[#allocation7 + $0xf4] ss:$8 sps:$4 sm:$0xff]   ;;  %v852_v49 = vld [vmem:[#allocation7 + $0xf0] ss:$8 sps:$4 sm:$0xff]  }
  0x5b   :  { %v853_v50 = vld [vmem:[#allocation8 + $0x40] sm:$0xff]   ;;  %v855_v52 = vld [vmem:[#allocation8 + $0x48] sm:$0xff]   ;;  %v858_v55 = vld [vmem:[#allocation8 + $0x10] sm:$0xff]   ;;  %v101_v63 = vshrl.u32 %v100_v62, 7 }
  0x5c   :  { %199 = vmatpush1.bf16.msra.mxu0 %v795_v13  ;;  %446 = vmatpush1.bf16.msra.mxu1 %v816_v22  ;;  %v854_v51 = vld [vmem:[#allocation8] sm:$0xff]   ;;  %v856_v53 = vld [vmem:[#allocation8 + $0x8] sm:$0xff]   ;;  %v859_v56 = vld [vmem:[#allocation8 + $0x58] sm:$0xff]  }
  0x5d   :  { %200 = vmatprep.subr.bf16.mxu0 %v796_v16  ;;  %447 = vmatprep.subr.bf16.mxu1 %v817_v23  ;;  %v860_v57 = vld [vmem:[#allocation8 + $0x18] sm:$0xff]   ;;  %v861_v58 = vld [vmem:[#allocation8 + $0x60] sm:$0xff]   ;;  %v863_v60 = vld [vmem:[#allocation8 + $0x68] sm:$0xff]   ;;  %v102_v0 = vsub.s32 0, %v101_v63  ;;  %v106_v2 = vsub.s32 1, %v101_v63 }
  0x5e   :  { %v862_v59 = vld [vmem:[#allocation8 + $0x20] sm:$0xff]   ;;  %v864_v61 = vld [vmem:[#allocation8 + $0x28] sm:$0xff]   ;;  %v98_v1 = vld [vmem:[%s1116_s2] sm:$0x3] }
  0x5f   :  { %v103_v3 = vrot.slane %v98_v1, %v102_v0  ;;  %v107_v4 = vrot.slane %v98_v1, %v106_v2  ;;  %v865_v15 = vld [vmem:[#allocation8 + $0x70] sm:$0xff]   ;;  %v868_v18 = vld [vmem:[#allocation8 + $0x38] sm:$0xff]  }
  0x60   :  { %201 = vmatpush1.bf16.msra.mxu0 %v798_v17  ;;  %448 = vmatpush1.bf16.msra.mxu1 %v819_v26  ;;  %v866_v16 = vld [vmem:[#allocation8 + $0x30] sm:$0xff]   ;;  %v867_v17 = vld [vmem:[#allocation8 + $0x78] sm:$0xff]  }
  0x61   :  { %202 = vmatprep.subr.bf16.mxu0 %v799_v20  ;;  %449 = vmatprep.subr.bf16.mxu1 %v820_v27  ;;  %v267_v19 = vld [vmem:[%s1118_s4] sm:$0x3]  ;;  %s998_s4 = smov [#allocation10]  }
  0x62   :  { %v272_v20 = vrot.slane %v267_v19, %v102_v0  ;;  %s673_s30 = sshll.u32 %s998_s4, 4  ;;  %s674_s30 = int_to_ptr.vmem [resolvable:$true] %s673_s30 }
  0x63   :  { %s959_s8 = scalar_lea.vmem %s674_s30, 128  ;;  %p964_p5 = scmp.lt.s32.totalorder %s674_s30, %s674_s30 }
  0x64   :  { %203 = vmatpush1.bf16.msra.mxu0 %v801_v21  ;;  %450 = vmatpush1.bf16.msra.mxu1 %v822_v29  ;;  %v276_v21 = vrot.slane %v267_v19, %v106_v2  ;;  %p960_p4 = scmp.ne.s32.totalorder %s674_s30, %s959_s8  ;;  %p965_p6 = scmp.lt.s32.totalorder %s959_s8, %s959_s8 }
  0x65   :  { %204 = vmatprep.subr.bf16.mxu0 %v802_v24  ;;  %451 = vmatprep.subr.bf16.mxu1 %v823_v30 }
  0x66   :  { %p966_p7 = por %p965_p6, %p964_p5 }
  0x68   :  { %205 = vmatpush1.bf16.msra.mxu0 %v804_v25  ;;  %452 = vmatpush1.bf16.msra.mxu1 %v825_v31  ;;  %p967_p8 = pnand %p966_p7, %p960_p4 }
  0x69   :  { %453 = vmatprep.subr.bf16.mxu1 %v826_v32  ;;  %749 = vmatprep.subr.bf16.mxu0 %v853_v50 }
  0x6b   :  { %223 = vmatmul.mubr.bf16.vlgmr.msra.gmra.mrb[0].mxu0 %v81_v28 }
  0x6c   :  { %454 = vmatpush1.bf16.msra.mxu1 %v828_v33  ;;  %750 = vmatpush3.bf16.msra.mxu0 %v854_v51  ;;  %v732_v33 = vld [vmem:[%s1120_s6] ss:$0 sm:$0xff] }
  0x6d   :  { %455 = vmatprep.subr.bf16.mxu1 %v829_v34  ;;  %751 = vmatprep.subr.bf16.mxu0 %v855_v52 }
  0x70   :  { %456 = vmatpush1.bf16.msra.mxu1 %v831_v35  ;;  %752 = vmatpush3.bf16.msra.mxu0 %v856_v53 }
  0x71   :  { %457 = vmatprep.subr.bf16.mxu1 %v832_v36  ;;  %753 = vmatprep.subr.bf16.mxu0 %v857_v54 }
  0x74   :  { %458 = vmatpush1.bf16.msra.mxu1 %v834_v37  ;;  %754 = vmatpush3.bf16.msra.mxu0 %v858_v55 }
  0x75   :  { %459 = vmatprep.subr.bf16.mxu1 %v835_v38  ;;  %755 = vmatprep.subr.bf16.mxu0 %v859_v56 }
  0x78   :  { %460 = vmatpush1.bf16.msra.mxu1 %v837_v39  ;;  %756 = vmatpush3.bf16.msra.mxu0 %v860_v57  ;;  %v663_v39 = vand.u32 127, %v100_v62 }
  0x79   :  { %461 = vmatprep.subr.bf16.mxu1 %v838_v40  ;;  %757 = vmatprep.subr.bf16.mxu0 %v861_v58 }
  0x7a   :  { %vm664_vm0 = vcmp.lt.s32.totalorder %v663_v39, 8 }
  0x7c   :  { %462 = vmatpush1.bf16.msra.mxu1 %v840_v41  ;;  %758 = vmatpush3.bf16.msra.mxu0 %v862_v59 }
  0x7d   :  { %463 = vmatprep.subr.bf16.mxu1 %v841_v42  ;;  %759 = vmatprep.subr.bf16.mxu0 %v863_v60 }
  0x80   :  { %464 = vmatpush1.bf16.msra.mxu1 %v843_v43  ;;  %760 = vmatpush3.bf16.msra.mxu0 %v864_v61 }
  0x81   :  { %465 = vmatprep.subr.bf16.mxu1 %v844_v44  ;;  %761 = vmatprep.subr.bf16.mxu0 %v865_v15 }
  0x84   :  { %466 = vmatpush1.bf16.msra.mxu1 %v846_v45  ;;  %762 = vmatpush3.bf16.msra.mxu0 %v866_v16 }
  0x85   :  { %467 = vmatprep.subr.bf16.mxu1 %v847_v46  ;;  %763 = vmatprep.subr.bf16.mxu0 %v867_v17 }
  0x88   :  { %468 = vmatpush1.bf16.msra.mxu1 %v849_v47  ;;  %764 = vmatpush3.bf16.msra.mxu0 %v868_v18 }
  0x89   :  { %469 = vmatprep.subr.bf16.mxu1 %v850_v48 }
  0x8c   :  { %470 = vmatpush1.bf16.msra.mxu1 %v852_v49 }
 0x13e   :  { %v224_v5 = vpop.f32.mrb[0].mxu0 }
 0x13f   :  { %v225_v6 = vadd.f32 %v224_v5, %v103_v3  ;;  %v226_v7 = vpop.f32.mrb[1].mxu0 }
 0x140   :  { %v227_v8 = vadd.f32 %v226_v7, %v107_v4  ;;  %v228_v9 = vpop.f32.mrb[2].mxu0 }
 0x141   :  { %v231_v10 = vmax.f32 %v225_v6, 0.0  ;;  %v229_v11 = vpop.f32.mrb[3].mxu0 }
 0x142   :  { %v232_v12 = vmax.f32 %v227_v8, 0.0 }
 0x143   :  { %v233_v14 = vpack.c.bf16 %v231_v10, %v231_v10 }
 0x144   :  { %v234_v13 = vpack.c.bf16 %v232_v12, %v232_v12 }
 0x146   :  { %471 = vmatprep.mubr.bf16.mxu1 %v234_v13 }
 0x147   :  { %472 = vmatmul.mubr.bf16.vlgmr.msra.gmra.mrb[0].mxu1 %v233_v14 }
 0x21a   :  { %v473_v22 = vpop.f32.mrb[0].mxu1 }
 0x21b   :  { %v474_v23 = vadd.f32 %v473_v22, %v272_v20  ;;  %v475_v24 = vpop.f32.mrb[1].mxu1 }
 0x21c   :  { %v476_v25 = vadd.f32 %v475_v24, %v276_v21  ;;  %v477_v26 = vpop.f32.mrb[2].mxu1 }
 0x21d   :  { %v480_v27 = vmax.f32 %v474_v23, 0.0  ;;  %v478_v28 = vpop.f32.mrb[3].mxu1 }
 0x21e   :  { %v481_v29 = vmax.f32 %v476_v25, 0.0 }
 0x21f   :  { %v482_v31 = vpack.c.bf16 %v480_v27, %v480_v27 }
 0x220   :  { %v483_v30 = vpack.c.bf16 %v481_v29, %v481_v29 }
 0x222   :  { %651 = vmatprep.mubr.bf16.mxu0 %v483_v30 }
 0x223   :  { %652 = vmatmul.mubr.bf16.vlgmr.msra.gmra.mrb[4].mxu0 %v482_v31 }
 0x2f6   :  { %v765_v32 = vpop.f32.mrb[4].mxu0 }
 0x2f7   :  { %v766_v34 = vpop.f32.mrb[5].mxu0 }
 0x2f8   :  { %v767_v35 = vadd.f32 %v766_v34, %v765_v32  ;;  %v768_v36 = vpop.f32.mrb[6].mxu0 }
 0x2f9   :  { %v769_v37 = vpop.f32.mrb[7].mxu0 }
 0x2fa   :  { %v654_v38 = vadd.f32 %v767_v35, %v732_v33 }
 0x2fc   :  { %869 = vtanh.f32 %v654_v38 }
 0x306   :  { %v870_v40 = vpop.eup %869 }
 0x307   :  { %v660_v41 = vmul.f32 3.5, %v870_v40 }
 0x309   :  { %v661_v42 = vadd.f32 -1.5, %v660_v41 }
 0x30b   :  { %v665_v43 = vsel %vm664_vm0, %v654_v38, %v661_v42 }
 0x30c   :  { %666 = vst [vmem:[#allocation10] sm:$0xff] %v665_v43 }
 0x30d   :  { %970 = shalt.err (!%p967_p8)
}
 0x30e   :  { %s971_s10 = scalar_lea.hbm %s1121_s7, 128 }
 0x30f   :  { %p972_p9 = scmp.ne.s32.totalorder %s1121_s7, %s971_s10  ;;  %p975_p10 = scmp.lt.u32.totalorder %s971_s10, %s1121_s7 }
 0x311   :  { %p977_p11 = pnand %p975_p10, %p972_p9 }
 0x313   :  { %980 = shalt.err (!%p977_p11)
}
 0x314   :  { %676 = dma.vmem_to_hbm [thread:$0]  %s674_s30, 128, %s1121_s7, [#allocation4]  }
 0x315   :  { %987 = dma.done.wait [#allocation4], 128  }
 0x316   :  { %988 = vsyncadd [#allocation4], 4294967168 }
 0x317   :  { %680 = vsyncpa [#allocation3], 1 }
 0x318   :  { %681 = vsyncpa [#allocation6], 1 }
 0x319   :  { %682 = vsyncpa [#allocation9], 1 }
 0x31a   :  { %683 = vsyncpa [#allocation4], 1 }

</bundles_post_ra>
